<compile_context>
chip_gen: v7x
topology: tpu7x:2x2x1
jax: 0.10.0
libtpu: 0.0.40
codegen_flags: <defaults>
</compile_context>

<pallas_src>
import math

import jax
import jax.numpy as jnp
from jax.experimental import pallas as pl
from jax.experimental.pallas import tpu as pltpu

_INV_SQRT2 = 0.7071067811865476


def mlp_kernel(x_ref, w1_ref, b1_ref, w2_ref, b2_ref, o_ref, acc_ref):
    """One (row-block, hidden-chunk) grid step of the fused MLP."""
    j = pl.program_id(1)

    @pl.when(j == 0)
    def _():
        acc_ref[...] = jnp.zeros_like(acc_ref)

    # fc1 chunk on the MXU: bf16 operands, f32 accumulation.
    x = x_ref[...].astype(jnp.bfloat16)
    h = jnp.dot(x, w1_ref[...], preferred_element_type=jnp.float32) + b1_ref[...]

    # Exact GELU (torch.nn.GELU default):  0.5 * h * (1 + erf(h / sqrt(2))),
    # kept in f32 (VPU polynomial).
    h = 0.5 * h * (1.0 + jax.lax.erf(h * _INV_SQRT2))

    # Dropout(p=0.0) is the identity -> no-op.

    # fc2 partial product, accumulated into the resident f32 scratch.
    acc_ref[...] += jnp.dot(
        h.astype(jnp.bfloat16), w2_ref[...], preferred_element_type=jnp.float32
    )

    @pl.when(j == pl.num_programs(1) - 1)
    def _():
        o_ref[...] = (acc_ref[...] + b2_ref[...]).astype(o_ref.dtype)


def _round_up(a, b):
    return (a + b - 1) // b * b


def _pick_hidden_chunk(H, target=2048):
    """Chunk size along the hidden dim: H itself when small, else the largest
    divisor of H that is a multiple of 128 and <= target (keeps per-step
    weight chunks VMEM-friendly on v7x's 64 MiB)."""
    if H <= target:
        return H
    c = (target // 128) * 128
    while c >= 128:
        if H % c == 0:
            return c
        c -= 128
    return H  # fall back to fully-resident weights


def _pick_row_block(M, cap=512):
    """Row-block size: multiple of 8 sublanes, <= cap, and >= 2 row blocks
    whenever M > 8 so the parallel grid axis can use both TCs on v7x."""
    if M <= 8:
        return M
    return max(8, min(cap, _round_up((M + 1) // 2, 8)))


def _vmem_limit_bytes(tm, D, th, x_itemsize, out_itemsize):
    est = (
        2 * tm * D * x_itemsize        # x row tiles (double-buffered)
        + 2 * tm * D * out_itemsize    # output row tiles
        + 2 * 2 * D * th * 2           # W1 + W2 chunks, bf16, double-buffered
        + 2 * (th + D) * 4             # biases, f32
        + tm * D * 4                   # f32 accumulator scratch
        + 2 * tm * th * 4              # hidden-activation temporaries
    )
    # Generous headroom, clamped to what every generation can actually scope.
    return int(min(64 * 1024 * 1024, max(16 * 1024 * 1024, 2 * est)))


@jax.jit
def mlp_forward(x, params):
    """x: (..., in_dim).  Returns same shape and dtype, like the PyTorch module."""
    w1, b1, w2, b2 = params["w1"], params["b1"], params["w2"], params["b2"]
    D, H = w1.shape  # in_dim, 2 * in_dim

    orig_shape = x.shape
    x2d = x.reshape(-1, D)          # native dtype; cast to bf16 inside the kernel
    M = x2d.shape[0]

    # bf16 MXU operands; biases stay f32 (added to the f32 accumulator).
    w1b = w1.astype(jnp.bfloat16)
    w2b = w2.astype(jnp.bfloat16)
    b1f = b1.astype(jnp.float32).reshape(1, H)
    b2f = b2.astype(jnp.float32).reshape(1, D)

    tm = _pick_row_block(M)
    th = _pick_hidden_chunk(H)
    nr = pl.cdiv(M, tm)
    nh = H // th

    out = pl.pallas_call(
        mlp_kernel,
        out_shape=jax.ShapeDtypeStruct((M, D), x.dtype),
        grid_spec=pltpu.PrefetchScalarGridSpec(
            num_scalar_prefetch=0,
            grid=(nr, nh),
            in_specs=[
                pl.BlockSpec((tm, D), lambda i, j: (i, 0)),   # x row block
                pl.BlockSpec((D, th), lambda i, j: (0, j)),   # W1 chunk
                pl.BlockSpec((1, th), lambda i, j: (0, j)),   # b1 chunk
                pl.BlockSpec((th, D), lambda i, j: (j, 0)),   # W2 chunk
                pl.BlockSpec((1, D), lambda i, j: (0, 0)),    # b2 (resident)
            ],
            out_specs=pl.BlockSpec((tm, D), lambda i, j: (i, 0)),
            scratch_shapes=[pltpu.VMEM((tm, D), jnp.float32)],
        ),
        compiler_params=pltpu.CompilerParams(
            dimension_semantics=("parallel", "arbitrary"),
            vmem_limit_bytes=_vmem_limit_bytes(
                tm, D, th, x2d.dtype.itemsize, x.dtype.itemsize
            ),
        ),
    )(x2d, w1b, b1f, w2b, b2f)

    return out.reshape(orig_shape)


def init_params(key, in_dim):
    """PyTorch nn.Linear-style init; weights stored as (in, out), f32."""
    k1, k2, k3, k4 = jax.random.split(key, 4)
    hidden = in_dim * 2

    def lin(kw, kb, fan_in, fan_out):
        bound = 1.0 / math.sqrt(fan_in)
        w = jax.random.uniform(kw, (fan_in, fan_out), jnp.float32, -bound, bound)
        b = jax.random.uniform(kb, (1, fan_out), jnp.float32, -bound, bound)
        return w, b

    w1, b1 = lin(k1, k2, in_dim, hidden)
    w2, b2 = lin(k3, k4, hidden, in_dim)
    return dict(w1=w1, b1=b1, w2=w2, b2=b2)


def mlp_forward_ref(x, params, match_kernel_precision=False):
    """Pure-JAX reference mirroring the PyTorch forward (exact GELU, p=0 dropout).

    With match_kernel_precision=True it applies the same bf16 operand rounding
    the kernel uses (f32 accumulation), for a tight kernel-vs-XLA comparison.
    """
    w1, b1, w2, b2 = params["w1"], params["b1"], params["w2"], params["b2"]
    if match_kernel_precision:
        xm = x.astype(jnp.bfloat16)
        w1 = w1.astype(jnp.bfloat16)
        w2 = w2.astype(jnp.bfloat16)
        prec = None
    else:
        xm = x
        prec = jax.lax.Precision.HIGHEST
    h = jnp.dot(xm, w1, preferred_element_type=jnp.float32, precision=prec) + b1
    h = 0.5 * h * (1.0 + jax.lax.erf(h * _INV_SQRT2))
    if match_kernel_precision:
        h = h.astype(jnp.bfloat16)
    o = jnp.dot(h, w2, preferred_element_type=jnp.float32, precision=prec) + b2
    return o.astype(x.dtype)


if __name__ == "__main__":
    # Small shapes consistent with the module: tokens (B=2, S=8), in_dim=256.
    B, S, in_dim = 2, 8, 256

    key = jax.random.PRNGKey(0)
    k_x, k_p = jax.random.split(key)

    x = jax.random.normal(k_x, (B, S, in_dim), jnp.float32)
    params = init_params(k_p, in_dim)

    y = mlp_forward(x, params)
    jax.block_until_ready(y)

    assert y.shape == x.shape and y.dtype == x.dtype

    # Tight check against a reference that uses the same bf16 operand rounding.
    y_match = mlp_forward_ref(x, params, match_kernel_precision=True)
    assert jnp.allclose(y, y_match, atol=2e-3, rtol=2e-3)

    # Loose check against the full-f32 (torch-semantics) reference.
    y_f32 = mlp_forward_ref(x, params, match_kernel_precision=False)
    assert jnp.allclose(y, y_f32, atol=3e-2, rtol=3e-2)

    print("KERNEL_OK")
</pallas_src>

<mosaic_0001>
module attributes {stable_mosaic.version = 11 : i64} {
  func.func @mlp_kernel(%arg0: i32, %arg1: i32, %arg2: memref<8x256xf32, #tpu.memory_space<vmem>>, %arg3: memref<256x512xbf16, #tpu.memory_space<vmem>>, %arg4: memref<1x512xf32, #tpu.memory_space<vmem>>, %arg5: memref<512x256xbf16, #tpu.memory_space<vmem>>, %arg6: memref<1x256xf32, #tpu.memory_space<vmem>>, %arg7: memref<8x256xf32, #tpu.memory_space<vmem>>, %arg8: memref<8x256xf32, #tpu.memory_space<vmem>>) attributes {dimension_semantics = [#tpu.dimension_semantics<parallel>, #tpu.dimension_semantics<arbitrary>], iteration_bounds = array<i64: 2, 1>, scalar_prefetch = 0 : i64, scratch_operands = 1 : i64, tpu.core_type = #tpu.core_type<tc>, window_params = [{transform_indices = @transform_0, window_bounds = array<i64: 8, 256>}, {transform_indices = @transform_1, window_bounds = array<i64: 256, 512>}, {transform_indices = @transform_2, window_bounds = array<i64: 1, 512>}, {transform_indices = @transform_3, window_bounds = array<i64: 512, 256>}, {pipeline_mode = #tpu.pipeline_mode<synchronous>, transform_indices = @transform_4, window_bounds = array<i64: 1, 256>}, {transform_indices = @transform_5, window_bounds = array<i64: 8, 256>}]} {
    %c0_i32 = arith.constant 0 : i32
    %0 = arith.cmpi eq, %arg1, %c0_i32 : i32
    %1 = arith.extui %0 : i1 to i32
    %c0_i32_0 = arith.constant 0 : i32
    %2 = arith.cmpi ne, %1, %c0_i32_0 : i32
    scf.if %2 {
      %cst_18 = arith.constant 0.000000e+00 : f32
      %27 = vector.broadcast %cst_18 : f32 to vector<8x256xf32>
      %c0_19 = arith.constant 0 : index
      %c0_20 = arith.constant 0 : index
      %28 = vector.load %arg8[%c0_19, %c0_20] : memref<8x256xf32, #tpu.memory_space<vmem>>, vector<8x256xf32>
      tpu.vector_store %arg8[%c0_19, %c0_20], %27 {strides = array<i32>} : memref<8x256xf32, #tpu.memory_space<vmem>>, vector<8x256xf32>,
    } else {
    }
    %c0 = arith.constant 0 : index
    %c0_1 = arith.constant 0 : index
    %3 = vector.load %arg2[%c0, %c0_1] : memref<8x256xf32, #tpu.memory_space<vmem>>, vector<8x256xf32>
    %4 = arith.truncf %3 : vector<8x256xf32> to vector<8x256xbf16>
    %c0_2 = arith.constant 0 : index
    %c0_3 = arith.constant 0 : index
    %5 = vector.load %arg3[%c0_2, %c0_3] : memref<256x512xbf16, #tpu.memory_space<vmem>>, vector<256x512xbf16>
    %cst = arith.constant dense<0.000000e+00> : vector<8x512xf32>
    %6 = tpu.matmul %4, %5, %cst {dimension_numbers = #tpu.dot_dimension_numbers<[1], [0], [0], [1], [0, 0, 1, 1], [], []>} : vector<8x256xbf16>, vector<256x512xbf16>, vector<8x512xf32> -> vector<8x512xf32>
    %c0_4 = arith.constant 0 : index
    %c0_5 = arith.constant 0 : index
    %7 = vector.load %arg4[%c0_4, %c0_5] : memref<1x512xf32, #tpu.memory_space<vmem>>, vector<1x512xf32>
    %8 = vector.broadcast %7 : vector<1x512xf32> to vector<8x512xf32>
    %9 = arith.addf %6, %8 : vector<8x512xf32>
    %cst_6 = arith.constant 5.000000e-01 : f32
    %10 = vector.broadcast %cst_6 : f32 to vector<8x512xf32>
    %11 = arith.mulf %10, %9 : vector<8x512xf32>
    %cst_7 = arith.constant 0.707106769 : f32
    %12 = vector.broadcast %cst_7 : f32 to vector<8x512xf32>
    %13 = arith.mulf %9, %12 : vector<8x512xf32>
    %14 = math.erf %13 : vector<8x512xf32>
    %cst_8 = arith.constant 1.000000e+00 : f32
    %15 = vector.broadcast %cst_8 : f32 to vector<8x512xf32>
    %16 = arith.addf %15, %14 : vector<8x512xf32>
    %17 = arith.mulf %11, %16 : vector<8x512xf32>
    %c0_9 = arith.constant 0 : index
    %c0_10 = arith.constant 0 : index
    %18 = vector.load %arg8[%c0_9, %c0_10] : memref<8x256xf32, #tpu.memory_space<vmem>>, vector<8x256xf32>
    %19 = arith.truncf %17 : vector<8x512xf32> to vector<8x512xbf16>
    %c0_11 = arith.constant 0 : index
    %c0_12 = arith.constant 0 : index
    %20 = vector.load %arg5[%c0_11, %c0_12] : memref<512x256xbf16, #tpu.memory_space<vmem>>, vector<512x256xbf16>
    %cst_13 = arith.constant dense<0.000000e+00> : vector<8x256xf32>
    %21 = tpu.matmul %19, %20, %cst_13 {dimension_numbers = #tpu.dot_dimension_numbers<[1], [0], [0], [1], [0, 0, 1, 1], [], []>} : vector<8x512xbf16>, vector<512x256xbf16>, vector<8x256xf32> -> vector<8x256xf32>
    %22 = arith.addf %18, %21 : vector<8x256xf32>
    %c0_14 = arith.constant 0 : index
    %c0_15 = arith.constant 0 : index
    %23 = vector.load %arg8[%c0_14, %c0_15] : memref<8x256xf32, #tpu.memory_space<vmem>>, vector<8x256xf32>
    tpu.vector_store %arg8[%c0_14, %c0_15], %22 {strides = array<i32>} : memref<8x256xf32, #tpu.memory_space<vmem>>, vector<8x256xf32>,
    %c0_i32_16 = arith.constant 0 : i32
    %24 = arith.cmpi eq, %arg1, %c0_i32_16 : i32
    %25 = arith.extui %24 : i1 to i32
    %c0_i32_17 = arith.constant 0 : i32
    %26 = arith.cmpi ne, %25, %c0_i32_17 : i32
    scf.if %26 {
      %c0_18 = arith.constant 0 : index
      %c0_19 = arith.constant 0 : index
      %27 = vector.load %arg8[%c0_18, %c0_19] : memref<8x256xf32, #tpu.memory_space<vmem>>, vector<8x256xf32>
      %c0_20 = arith.constant 0 : index
      %c0_21 = arith.constant 0 : index
      %28 = vector.load %arg6[%c0_20, %c0_21] : memref<1x256xf32, #tpu.memory_space<vmem>>, vector<1x256xf32>
      %29 = vector.broadcast %28 : vector<1x256xf32> to vector<8x256xf32>
      %30 = arith.addf %27, %29 : vector<8x256xf32>
      %c0_22 = arith.constant 0 : index
      %c0_23 = arith.constant 0 : index
      %31 = vector.load %arg7[%c0_22, %c0_23] : memref<8x256xf32, #tpu.memory_space<vmem>>, vector<8x256xf32>
      tpu.vector_store %arg7[%c0_22, %c0_23], %30 {strides = array<i32>} : memref<8x256xf32, #tpu.memory_space<vmem>>, vector<8x256xf32>,
    } else {
    }
    return
  }
  func.func @transform_0(%arg0: i32, %arg1: i32) -> (i32, i32) {
    %c0_i32 = arith.constant 0 : i32
    %c0_i32_0 = arith.constant 0 : i32
    return %arg0, %c0_i32 : i32, i32
  }
  func.func @transform_1(%arg0: i32, %arg1: i32) -> (i32, i32) {
    %c0_i32 = arith.constant 0 : i32
    %c0_i32_0 = arith.constant 0 : i32
    return %c0_i32, %arg1 : i32, i32
  }
  func.func @transform_2(%arg0: i32, %arg1: i32) -> (i32, i32) {
    %c0_i32 = arith.constant 0 : i32
    %c0_i32_0 = arith.constant 0 : i32
    return %c0_i32, %arg1 : i32, i32
  }
  func.func @transform_3(%arg0: i32, %arg1: i32) -> (i32, i32) {
    %c0_i32 = arith.constant 0 : i32
    %c0_i32_0 = arith.constant 0 : i32
    return %arg1, %c0_i32 : i32, i32
  }
  func.func @transform_4(%arg0: i32, %arg1: i32) -> (i32, i32) {
    %c0_i32 = arith.constant 0 : i32
    %c0_i32_0 = arith.constant 0 : i32
    %c0_i32_1 = arith.constant 0 : i32
    return %c0_i32, %c0_i32_0 : i32, i32
  }
  func.func @transform_5(%arg0: i32, %arg1: i32) -> (i32, i32) {
    %c0_i32 = arith.constant 0 : i32
    %c0_i32_0 = arith.constant 0 : i32
    return %arg0, %c0_i32 : i32, i32
  }
}

</mosaic_0001>

<bundles_post_ra>
// kernel: mlp_forward.1
= control target key start
LH: loop header
LB: loop body
LE: loop exit
PB: predicated region body
PF: predicated region fallthrough
CT: control target
= control target key end

     0   :  { %10 = vsyncpa [#allocation4], 0  ;;  %s2458_s0 = inlined_call_operand.vmem [shape: f32[16,256], index: 0, kind: input, shape index: {}]   ;;  %s2459_s1 = inlined_call_operand.vmem [shape: bf16[256,512], index: 1, kind: input, shape index: {}]   ;;  %s2460_s2 = inlined_call_operand.vmem [shape: f32[1,512], index: 2, kind: input, shape index: {}]   ;;  %s2461_s3 = inlined_call_operand.vmem [shape: bf16[512,256], index: 3, kind: input, shape index: {}]   ;;  %s2462_s4 = inlined_call_operand.vmem [shape: f32[1,256], index: 4, kind: input, shape index: {}]   ;;  %s2463_s5 = inlined_call_operand.hbm [shape: f32[16,256], index: 5, kind: output, shape index: {}]  }
   0x1   :  { %12 = vsyncpa [#allocation4 + $0x1], 0  ;;  %s1952_s18 = smov 0   ;;  %s1954_s19 = smov 0  }
   0x2   :  { %s1956_s20 = smov 0   ;;  %s1958_s21 = smov 0  }
   0x3   :  { %s1960_s22 = smov 0   ;;  %s1962_s23 = smov 0  }
   0x4 LB: > { %s1440_s24 = sadd.s32 4294967295, %s1919_s23   ;;  %s1441_s25 = sadd.s32 4294967294, %s1919_s23   ;;  %s1919_s23 = sphi %s1962_s23, %s18_s23   ;;  %s1915_s22 = sphi %s1960_s22, %s2470_s22   ;;  %s1911_s21 = sphi %s1958_s21, %s2469_s21   ;;  %s1907_s20 = sphi %s1956_s20, %s2468_s20   ;;  %s1903_s19 = sphi %s1954_s19, %s2467_s19   ;;  %s1899_s18 = sphi %s1952_s18, %s2466_s18  }
   0x5   : > { %s30_s26 = sadd.s32 1, %s1915_s22  ;;  %s162_s27 = sadd.s32 1, %s1907_s20 }
   0x6   : > { %p32_p0 = scmp.ge.s32.totalorder %s30_s26, 2  ;;  %p172_p1 = scmp.ne.s32.totalorder %s1907_s20, %s1903_s19 }
   0x7   : > { %p173_p2 = scmp.eq.s32.totalorder %s1440_s24, 1  ;;  %p178_p3 = scmp.ne.s32.totalorder %s1903_s19, %s1899_s18 }
   0x8   : > { %s2472_s26 = smov (%p32_p0, %s30_s26), 0  ;;  %p179_p5 = scmp.eq.s32.totalorder %s1441_s25, 1 }
   0x9   : > { %p1992_p4 = por %p173_p2, %p172_p1  ;;  %s159_s29 = ssub.s32 %s1915_s22, %s2472_s26 }
   0xa   : > { %p1447_p6 = scmp.ge.s32.totalorder %s1919_s23, 1  ;;  %p160_p7 = scmp.eq.s32.totalorder %s159_s29, 0 }
   0xb   : > { %p1999_p8 = por %p179_p5, %p178_p3  ;;  %p235_p9 = scmp.lt.s32.totalorder %s1919_s23, 3 }
   0xc   : > { %s2005_s6 = scalar_select %p160_p7, %s1907_s20, %s162_s27  }
   0xd   : > { %p236_p10 = pnand %p1447_p6, %p235_p9 }
   0xe   : > { %v1641_v0 = vld [vmem:[%s2459_s1 + $0x4] ss:$16 sps:$4 sm:$0xff] (!%p236_p10)   ;;  %v1643_v1 = vld [vmem:[%s2459_s1 + $0xc] ss:$16 sps:$4 sm:$0xff] (!%p236_p10)   ;;  %v1645_v2 = vld [vmem:[%s2459_s1] ss:$16 sps:$4 sm:$0xff] (!%p236_p10)  }
   0xf   : > { %239 = sbr.rel (%p236_p10) target bundleno = 547 (0x223), region = 40  ;;  %717 = vmatprep.subr.bf16.mxu0 (!%p236_p10), %v1641_v0  ;;  %v1646_v3 = vld [vmem:[%s2459_s1 + $0x8] ss:$16 sps:$4 sm:$0xff] (!%p236_p10)   ;;  %758 = vmatprep.subr.bf16.mxu1 (!%p236_p10), %v1643_v1  ;;  %v1647_v4 = vld [vmem:[%s2459_s1 + $0x24] ss:$16 sps:$4 sm:$0xff] (!%p236_p10)   ;;  %p278_p11 = scmp.lt.s32.totalorder (!%p236_p10), %s1911_s21, 1 }
  0x10   : > { %718 = vmatpush1.bf16.msra.mxu0 (!%p236_p10), %v1645_v2  ;;  %759 = vmatpush1.bf16.msra.mxu1 (!%p236_p10), %v1646_v3  ;;  %v1649_v5 = vld [vmem:[%s2459_s1 + $0x2c] ss:$16 sps:$4 sm:$0xff] (!%p236_p10)   ;;  %v1651_v6 = vld [vmem:[%s2459_s1 + $0x20] ss:$16 sps:$4 sm:$0xff] (!%p236_p10)   ;;  %v1652_v7 = vld [vmem:[%s2459_s1 + $0x28] ss:$16 sps:$4 sm:$0xff] (!%p236_p10)  }
  0x11   : > { %719 = vmatprep.subr.bf16.mxu0 (!%p236_p10), %v1647_v4  ;;  %760 = vmatprep.subr.bf16.mxu1 (!%p236_p10), %v1649_v5  ;;  %v1653_v8 = vld [vmem:[%s2459_s1 + $0x44] ss:$16 sps:$4 sm:$0xff] (!%p236_p10)   ;;  %v1655_v9 = vld [vmem:[%s2459_s1 + $0x4c] ss:$16 sps:$4 sm:$0xff] (!%p236_p10)   ;;  %v1657_v10 = vld [vmem:[%s2459_s1 + $0x40] ss:$16 sps:$4 sm:$0xff] (!%p236_p10)  }
  0x12   : > { %v1658_v11 = vld [vmem:[%s2459_s1 + $0x48] ss:$16 sps:$4 sm:$0xff] (!%p236_p10)   ;;  %v1659_v12 = vld [vmem:[%s2459_s1 + $0x64] ss:$16 sps:$4 sm:$0xff] (!%p236_p10)   ;;  %v1661_v13 = vld [vmem:[%s2459_s1 + $0x6c] ss:$16 sps:$4 sm:$0xff] (!%p236_p10)  }
  0x13   : > { %v1663_v14 = vld [vmem:[%s2459_s1 + $0x60] ss:$16 sps:$4 sm:$0xff] (!%p236_p10)   ;;  %v1664_v15 = vld [vmem:[%s2459_s1 + $0x68] ss:$16 sps:$4 sm:$0xff] (!%p236_p10)   ;;  %v1665_v16 = vld [vmem:[%s2459_s1 + $0x84] ss:$16 sps:$4 sm:$0xff] (!%p236_p10)  }
  0x14   : > { %720 = vmatpush1.bf16.msra.mxu0 (!%p236_p10), %v1651_v6  ;;  %761 = vmatpush1.bf16.msra.mxu1 (!%p236_p10), %v1652_v7  ;;  %v1667_v17 = vld [vmem:[%s2459_s1 + $0x8c] ss:$16 sps:$4 sm:$0xff] (!%p236_p10)   ;;  %v1669_v18 = vld [vmem:[%s2459_s1 + $0x80] ss:$16 sps:$4 sm:$0xff] (!%p236_p10)   ;;  %v1670_v19 = vld [vmem:[%s2459_s1 + $0x88] ss:$16 sps:$4 sm:$0xff] (!%p236_p10)  }
  0x15   : > { %721 = vmatprep.subr.bf16.mxu0 (!%p236_p10), %v1653_v8  ;;  %762 = vmatprep.subr.bf16.mxu1 (!%p236_p10), %v1655_v9  ;;  %v1671_v20 = vld [vmem:[%s2459_s1 + $0xa4] ss:$16 sps:$4 sm:$0xff] (!%p236_p10)   ;;  %v1673_v21 = vld [vmem:[%s2459_s1 + $0xac] ss:$16 sps:$4 sm:$0xff] (!%p236_p10)   ;;  %v1675_v22 = vld [vmem:[%s2459_s1 + $0xa0] ss:$16 sps:$4 sm:$0xff] (!%p236_p10)  }
  0x16   : > { %v1676_v23 = vld [vmem:[%s2459_s1 + $0xa8] ss:$16 sps:$4 sm:$0xff]   ;;  %v1677_v24 = vld [vmem:[%s2459_s1 + $0xc4] ss:$16 sps:$4 sm:$0xff]   ;;  %v1679_v25 = vld [vmem:[%s2459_s1 + $0xcc] ss:$16 sps:$4 sm:$0xff]  }
  0x17   : > { %v1681_v26 = vld [vmem:[%s2459_s1 + $0xc0] ss:$16 sps:$4 sm:$0xff]   ;;  %v1682_v27 = vld [vmem:[%s2459_s1 + $0xc8] ss:$16 sps:$4 sm:$0xff]   ;;  %v1683_v28 = vld [vmem:[%s2459_s1 + $0xe4] ss:$16 sps:$4 sm:$0xff]  }
  0x18   : > { %722 = vmatpush1.bf16.msra.mxu0 %v1657_v10  ;;  %763 = vmatpush1.bf16.msra.mxu1 %v1658_v11  ;;  %v1685_v29 = vld [vmem:[%s2459_s1 + $0xec] ss:$16 sps:$4 sm:$0xff]   ;;  %v1687_v30 = vld [vmem:[%s2459_s1 + $0xe0] ss:$16 sps:$4 sm:$0xff]   ;;  %v1688_v31 = vld [vmem:[%s2459_s1 + $0xe8] ss:$16 sps:$4 sm:$0xff]  }
  0x19   : > { %723 = vmatprep.subr.bf16.mxu0 %v1659_v12  ;;  %764 = vmatprep.subr.bf16.mxu1 %v1661_v13  ;;  %v1689_v32 = vld [vmem:[%s2459_s1 + $0x104] ss:$16 sps:$4 sm:$0xff]   ;;  %v1691_v33 = vld [vmem:[%s2459_s1 + $0x10c] ss:$16 sps:$4 sm:$0xff]   ;;  %v1693_v34 = vld [vmem:[%s2459_s1 + $0x100] ss:$16 sps:$4 sm:$0xff]  }
  0x1a   : > { %v1694_v35 = vld [vmem:[%s2459_s1 + $0x108] ss:$16 sps:$4 sm:$0xff]   ;;  %v1695_v36 = vld [vmem:[%s2459_s1 + $0x124] ss:$16 sps:$4 sm:$0xff]   ;;  %v1697_v37 = vld [vmem:[%s2459_s1 + $0x12c] ss:$16 sps:$4 sm:$0xff]  }
  0x1b   : > { %s279_s8 = scalar_select %p278_p11, %s1911_s21, 1  ;;  %v1699_v38 = vld [vmem:[%s2459_s1 + $0x120] ss:$16 sps:$4 sm:$0xff]   ;;  %v1700_v39 = vld [vmem:[%s2459_s1 + $0x128] ss:$16 sps:$4 sm:$0xff]  }
  0x1c   : > { %724 = vmatpush1.bf16.msra.mxu0 %v1663_v14  ;;  %765 = vmatpush1.bf16.msra.mxu1 %v1664_v15  ;;  %v1701_v40 = vld [vmem:[%s2459_s1 + $0x144] ss:$16 sps:$4 sm:$0xff]   ;;  %v1703_v41 = vld [vmem:[%s2459_s1 + $0x14c] ss:$16 sps:$4 sm:$0xff]   ;;  %v1705_v42 = vld [vmem:[%s2459_s1 + $0x140] ss:$16 sps:$4 sm:$0xff]  }
  0x1d   : > { %725 = vmatprep.subr.bf16.mxu0 %v1665_v16  ;;  %766 = vmatprep.subr.bf16.mxu1 %v1667_v17  ;;  %s1584_s17 = sshll.u32 %s279_s8, 4  ;;  %v1706_v43 = vld [vmem:[%s2459_s1 + $0x148] ss:$16 sps:$4 sm:$0xff]   ;;  %v1707_v44 = vld [vmem:[%s2459_s1 + $0x164] ss:$16 sps:$4 sm:$0xff]   ;;  %s275_s24 = sand.u32 1, %s1903_s19  }
  0x1e   : > { %s2147_s12 = scalar_lea.vmem %s2458_s0, %s1584_s17  ;;  %v1709_v45 = vld [vmem:[%s2459_s1 + $0x16c] ss:$16 sps:$4 sm:$0xff]   ;;  %v1711_v47 = vld [vmem:[%s2459_s1 + $0x160] ss:$16 sps:$4 sm:$0xff]   ;;  %v1712_v48 = vld [vmem:[%s2459_s1 + $0x168] ss:$16 sps:$4 sm:$0xff]  }
  0x1f   : > { %v308_v46 = vld [vmem:[%s2147_s12 + $0x8] sm:$0xff]  ;;  %v1713_v50 = vld [vmem:[%s2459_s1 + $0x184] ss:$16 sps:$4 sm:$0xff]   ;;  %v1717_v52 = vld [vmem:[%s2459_s1 + $0x180] ss:$16 sps:$4 sm:$0xff]   ;;  %s1448_s17 = sshll.u32 %s275_s24, 4 }
  0x20   : > { %726 = vmatpush1.bf16.msra.mxu0 %v1669_v18  ;;  %767 = vmatpush1.bf16.msra.mxu1 %v1670_v19  ;;  %v310_v49 = vpack.c.bf16 %v308_v46, %v308_v46  ;;  %v1715_v51 = vld [vmem:[%s2459_s1 + $0x18c] ss:$16 sps:$4 sm:$0xff]   ;;  %v1718_v53 = vld [vmem:[%s2459_s1 + $0x188] ss:$16 sps:$4 sm:$0xff]   ;;  %v1719_v54 = vld [vmem:[%s2459_s1 + $0x1a4] ss:$16 sps:$4 sm:$0xff]  }
  0x21   : > { %727 = vmatprep.subr.bf16.mxu0 %v1671_v20  ;;  %768 = vmatprep.subr.bf16.mxu1 %v1673_v21  ;;  %v1721_v55 = vld [vmem:[%s2459_s1 + $0x1ac] ss:$16 sps:$4 sm:$0xff]   ;;  %v1723_v56 = vld [vmem:[%s2459_s1 + $0x1a0] ss:$16 sps:$4 sm:$0xff]   ;;  %v1724_v57 = vld [vmem:[%s2459_s1 + $0x1a8] ss:$16 sps:$4 sm:$0xff]  }
  0x22   : > { %749 = vmatprep.mubr.bf16.mxu0 %v310_v49  ;;  %790 = vmatprep.mubr.bf16.mxu1 %v310_v49  ;;  %v1725_v58 = vld [vmem:[%s2459_s1 + $0x1c4] ss:$16 sps:$4 sm:$0xff]   ;;  %v1727_v59 = vld [vmem:[%s2459_s1 + $0x1cc] ss:$16 sps:$4 sm:$0xff]   ;;  %v1729_v60 = vld [vmem:[%s2459_s1 + $0x1c0] ss:$16 sps:$4 sm:$0xff]  }
  0x23   : > { %v1730_v61 = vld [vmem:[%s2459_s1 + $0x1c8] ss:$16 sps:$4 sm:$0xff]   ;;  %v1731_v62 = vld [vmem:[%s2459_s1 + $0x1e4] ss:$16 sps:$4 sm:$0xff]   ;;  %v1733_v63 = vld [vmem:[%s2459_s1 + $0x1ec] ss:$16 sps:$4 sm:$0xff]  }
  0x24   : > { %728 = vmatpush1.bf16.msra.mxu0 %v1675_v22  ;;  %769 = vmatpush1.bf16.msra.mxu1 %v1676_v23  ;;  %v1735_v0 = vld [vmem:[%s2459_s1 + $0x1e0] ss:$16 sps:$4 sm:$0xff]   ;;  %v1736_v1 = vld [vmem:[%s2459_s1 + $0x1e8] ss:$16 sps:$4 sm:$0xff]   ;;  %v1739_v3 = vld [vmem:[%s2461_s3 + $0x4] ss:$8 sps:$4 sm:$0xff]  }
  0x25   : > { %729 = vmatprep.subr.bf16.mxu0 %v1677_v24  ;;  %770 = vmatprep.subr.bf16.mxu1 %v1679_v25  ;;  %v307_v2 = vld [vmem:[%s2147_s12] sm:$0xff]  ;;  %v1745_v8 = vld [vmem:[%s2461_s3 + $0x14] ss:$8 sps:$4 sm:$0xff]   ;;  %v1743_v10 = vld [vmem:[%s2461_s3 + $0x10] ss:$8 sps:$4 sm:$0xff]   ;;  %s1585_s29 = sshll.u32 %s1911_s21, 8 }
  0x26   : > { %v1742_v4 = vld [vmem:[%s2461_s3 + $0x104] ss:$8 sps:$4 sm:$0xff]   ;;  %v309_v5 = vpack.c.bf16 %v307_v2, %v307_v2  ;;  %v1737_v6 = vld [vmem:[%s2461_s3] ss:$8 sps:$4 sm:$0xff]   ;;  %v1748_v9 = vld [vmem:[%s2461_s3 + $0x114] ss:$8 sps:$4 sm:$0xff]   ;;  %s2411_s8 = scalar_lea.hbm %s2463_s5, %s1585_s29 }
  0x27   : > { %v1740_v7 = vld [vmem:[%s2461_s3 + $0x100] ss:$8 sps:$4 sm:$0xff]   ;;  %v1746_v11 = vld [vmem:[%s2461_s3 + $0x110] ss:$8 sps:$4 sm:$0xff]   ;;  %v1751_v12 = vld [vmem:[%s2461_s3 + $0x24] ss:$8 sps:$4 sm:$0xff]  }
  0x28   : > { %730 = vmatpush1.bf16.msra.mxu0 %v1681_v26  ;;  %771 = vmatpush1.bf16.msra.mxu1 %v1682_v27  ;;  %v1754_v13 = vld [vmem:[%s2461_s3 + $0x124] ss:$8 sps:$4 sm:$0xff]   ;;  %v1749_v14 = vld [vmem:[%s2461_s3 + $0x20] ss:$8 sps:$4 sm:$0xff]   ;;  %v1757_v16 = vld [vmem:[%s2461_s3 + $0x34] ss:$8 sps:$4 sm:$0xff]  }
  0x29   : > { %731 = vmatprep.subr.bf16.mxu0 %v1683_v28  ;;  %772 = vmatprep.subr.bf16.mxu1 %v1685_v29  ;;  %v1752_v15 = vld [vmem:[%s2461_s3 + $0x120] ss:$8 sps:$4 sm:$0xff]   ;;  %v1760_v17 = vld [vmem:[%s2461_s3 + $0x134] ss:$8 sps:$4 sm:$0xff]   ;;  %v1755_v18 = vld [vmem:[%s2461_s3 + $0x30] ss:$8 sps:$4 sm:$0xff]  }
  0x2a   : > { %v1758_v19 = vld [vmem:[%s2461_s3 + $0x130] ss:$8 sps:$4 sm:$0xff]   ;;  %v1763_v20 = vld [vmem:[%s2461_s3 + $0x44] ss:$8 sps:$4 sm:$0xff]   ;;  %v1761_v22 = vld [vmem:[%s2461_s3 + $0x40] ss:$8 sps:$4 sm:$0xff]  }
  0x2b   : > { %v1766_v21 = vld [vmem:[%s2461_s3 + $0x144] ss:$8 sps:$4 sm:$0xff]   ;;  %v1764_v23 = vld [vmem:[%s2461_s3 + $0x140] ss:$8 sps:$4 sm:$0xff]   ;;  %v1769_v24 = vld [vmem:[%s2461_s3 + $0x54] ss:$8 sps:$4 sm:$0xff]  }
  0x2c   : > { %732 = vmatpush1.bf16.msra.mxu0 %v1687_v30  ;;  %773 = vmatpush1.bf16.msra.mxu1 %v1688_v31  ;;  %v1772_v25 = vld [vmem:[%s2461_s3 + $0x154] ss:$8 sps:$4 sm:$0xff]   ;;  %v1767_v26 = vld [vmem:[%s2461_s3 + $0x50] ss:$8 sps:$4 sm:$0xff]   ;;  %v1775_v28 = vld [vmem:[%s2461_s3 + $0x64] ss:$8 sps:$4 sm:$0xff]  }
  0x2d   : > { %733 = vmatprep.subr.bf16.mxu0 %v1689_v32  ;;  %774 = vmatprep.subr.bf16.mxu1 %v1691_v33  ;;  %v1770_v27 = vld [vmem:[%s2461_s3 + $0x150] ss:$8 sps:$4 sm:$0xff]   ;;  %v1778_v29 = vld [vmem:[%s2461_s3 + $0x164] ss:$8 sps:$4 sm:$0xff]   ;;  %v1773_v30 = vld [vmem:[%s2461_s3 + $0x60] ss:$8 sps:$4 sm:$0xff]  }
  0x2e   : > { %v1776_v31 = vld [vmem:[%s2461_s3 + $0x160] ss:$8 sps:$4 sm:$0xff]   ;;  %v1781_v32 = vld [vmem:[%s2461_s3 + $0x74] ss:$8 sps:$4 sm:$0xff]   ;;  %v1827_v2 = vld [vmem:[%s2461_s3 + $0xf0] ss:$8 sps:$4 sm:$0xff]  }
  0x2f   : > { %v1784_v33 = vld [vmem:[%s2461_s3 + $0x174] ss:$8 sps:$4 sm:$0xff]   ;;  %v1797_v46 = vld [vmem:[%s2461_s3 + $0xa0] ss:$8 sps:$4 sm:$0xff]   ;;  %s277_s7 = scalar_lea.vmem [#allocation3], %s1448_s17  ;;  %s1317_s21 = scalar_lea.sflag [#allocation4], %s275_s24 }
  0x30   : > { %734 = vmatpush1.bf16.msra.mxu0 %v1693_v34  ;;  %775 = vmatpush1.bf16.msra.mxu1 %v1694_v35  ;;  %v1779_v34 = vld [vmem:[%s2461_s3 + $0x70] ss:$8 sps:$4 sm:$0xff]   ;;  %v1808_v49 = vld [vmem:[%s2461_s3 + $0x1b4] ss:$8 sps:$4 sm:$0xff]   ;;  %s1331_s9 = sshll.u32 %s277_s7, 4  ;;  %s1921_s14 = smov [#allocation3]   ;;  %s2413_s9 = int_to_ptr.vmem [resolvable:$true] %s1331_s9 }
  0x31   : > { %735 = vmatprep.subr.bf16.mxu0 %v1695_v36  ;;  %776 = vmatprep.subr.bf16.mxu1 %v1697_v37  ;;  %v1782_v35 = vld [vmem:[%s2461_s3 + $0x170] ss:$8 sps:$4 sm:$0xff]   ;;  %v1787_v36 = vld [vmem:[%s2461_s3 + $0x84] ss:$8 sps:$4 sm:$0xff]   ;;  %s1841_s13 = scalar_lea.vmem %s2413_s9, 256  ;;  %s1845_s15 = sshll.u32 %s1921_s14, 4  ;;  %s1846_s15 = int_to_ptr.vmem [resolvable:$false] %s1845_s15 }
  0x32   : > { %v1790_v37 = vld [vmem:[%s2461_s3 + $0x184] ss:$8 sps:$4 sm:$0xff]   ;;  %p1842_p12 = scmp.ne.s32.totalorder %s2413_s9, %s1841_s13  ;;  %s1847_s12 = scalar_lea.vmem %s1846_s15, 512 }
  0x33   : > { %p1848_p1 = scmp.lt.s32.totalorder %s2413_s9, %s1846_s15  ;;  %p1849_p2 = scmp.lt.s32.totalorder %s1847_s12, %s1841_s13 }
  0x34   : > { %736 = vmatpush1.bf16.msra.mxu0 %v1699_v38  ;;  %777 = vmatpush1.bf16.msra.mxu1 %v1700_v39  ;;  %v1785_v38 = vld [vmem:[%s2461_s3 + $0x80] ss:$8 sps:$4 sm:$0xff]   ;;  %p1843_p13 = pnand %p1842_p12, %p1992_p4 }
  0x35   : > { %737 = vmatprep.subr.bf16.mxu0 %v1701_v40  ;;  %778 = vmatprep.subr.bf16.mxu1 %v1703_v41  ;;  %v1788_v39 = vld [vmem:[%s2461_s3 + $0x180] ss:$8 sps:$4 sm:$0xff]   ;;  %v1793_v40 = vld [vmem:[%s2461_s3 + $0x94] ss:$8 sps:$4 sm:$0xff]   ;;  %p1850_p3 = por %p1849_p2, %p1848_p1 }
  0x36   : > { %v1796_v41 = vld [vmem:[%s2461_s3 + $0x194] ss:$8 sps:$4 sm:$0xff]   ;;  %p1844_p0 = pneg %p1843_p13 }
  0x38   : > { %738 = vmatpush1.bf16.msra.mxu0 %v1705_v42  ;;  %779 = vmatpush1.bf16.msra.mxu1 %v1706_v43  ;;  %v1791_v42 = vld [vmem:[%s2461_s3 + $0x90] ss:$8 sps:$4 sm:$0xff]   ;;  %p1851_p5 = pnand %p1850_p3, %p1844_p0 }
  0x39   : > { %739 = vmatprep.subr.bf16.mxu0 %v1707_v44  ;;  %780 = vmatprep.subr.bf16.mxu1 %v1709_v45  ;;  %v1794_v43 = vld [vmem:[%s2461_s3 + $0x190] ss:$8 sps:$4 sm:$0xff]   ;;  %v1799_v44 = vld [vmem:[%s2461_s3 + $0xa4] ss:$8 sps:$4 sm:$0xff]  }
  0x3a   : > { %v1802_v45 = vld [vmem:[%s2461_s3 + $0x1a4] ss:$8 sps:$4 sm:$0xff]  }
  0x3c   : > { %740 = vmatpush1.bf16.msra.mxu0 %v1711_v47  ;;  %781 = vmatpush1.bf16.msra.mxu1 %v1712_v48  ;;  %v1800_v47 = vld [vmem:[%s2461_s3 + $0x1a0] ss:$8 sps:$4 sm:$0xff]   ;;  %v1805_v48 = vld [vmem:[%s2461_s3 + $0xb4] ss:$8 sps:$4 sm:$0xff]  }
  0x3d   : > { %741 = vmatprep.subr.bf16.mxu0 %v1713_v50  ;;  %782 = vmatprep.subr.bf16.mxu1 %v1715_v51  ;;  %v1803_v50 = vld [vmem:[%s2461_s3 + $0xb0] ss:$8 sps:$4 sm:$0xff]  }
  0x3e   : > { %v1806_v51 = vld [vmem:[%s2461_s3 + $0x1b0] ss:$8 sps:$4 sm:$0xff]  }
  0x40   : > { %742 = vmatpush1.bf16.msra.mxu0 %v1717_v52  ;;  %783 = vmatpush1.bf16.msra.mxu1 %v1718_v53  ;;  %v1811_v52 = vld [vmem:[%s2461_s3 + $0xc4] ss:$8 sps:$4 sm:$0xff]  }
  0x41   : > { %743 = vmatprep.subr.bf16.mxu0 %v1719_v54  ;;  %784 = vmatprep.subr.bf16.mxu1 %v1721_v55  ;;  %v1814_v53 = vld [vmem:[%s2461_s3 + $0x1c4] ss:$8 sps:$4 sm:$0xff]   ;;  %v1809_v54 = vld [vmem:[%s2461_s3 + $0xc0] ss:$8 sps:$4 sm:$0xff]  }
  0x42   : > { %v1812_v55 = vld [vmem:[%s2461_s3 + $0x1c0] ss:$8 sps:$4 sm:$0xff]  }
  0x44   : > { %744 = vmatpush1.bf16.msra.mxu0 %v1723_v56  ;;  %785 = vmatpush1.bf16.msra.mxu1 %v1724_v57  ;;  %v1817_v56 = vld [vmem:[%s2461_s3 + $0xd4] ss:$8 sps:$4 sm:$0xff]  }
  0x45   : > { %745 = vmatprep.subr.bf16.mxu0 %v1725_v58  ;;  %786 = vmatprep.subr.bf16.mxu1 %v1727_v59  ;;  %v1820_v57 = vld [vmem:[%s2461_s3 + $0x1d4] ss:$8 sps:$4 sm:$0xff]   ;;  %v1815_v58 = vld [vmem:[%s2461_s3 + $0xd0] ss:$8 sps:$4 sm:$0xff]  }
  0x46   : > { %v1818_v59 = vld [vmem:[%s2461_s3 + $0x1d0] ss:$8 sps:$4 sm:$0xff]  }
  0x48   : > { %746 = vmatpush1.bf16.msra.mxu0 %v1729_v60  ;;  %787 = vmatpush1.bf16.msra.mxu1 %v1730_v61  ;;  %v1823_v60 = vld [vmem:[%s2461_s3 + $0xe4] ss:$8 sps:$4 sm:$0xff]  }
  0x49   : > { %747 = vmatprep.subr.bf16.mxu0 %v1731_v62  ;;  %788 = vmatprep.subr.bf16.mxu1 %v1733_v63  ;;  %v1826_v61 = vld [vmem:[%s2461_s3 + $0x1e4] ss:$8 sps:$4 sm:$0xff]   ;;  %v1821_v62 = vld [vmem:[%s2461_s3 + $0xe0] ss:$8 sps:$4 sm:$0xff]  }
  0x4a   : > { %v1824_v63 = vld [vmem:[%s2461_s3 + $0x1e0] ss:$8 sps:$4 sm:$0xff]  }
  0x4c   : > { %748 = vmatpush1.bf16.msra.mxu0 %v1735_v0  ;;  %789 = vmatpush1.bf16.msra.mxu1 %v1736_v1  ;;  %v1829_v0 = vld [vmem:[%s2461_s3 + $0xf4] ss:$8 sps:$4 sm:$0xff]  }
  0x4d   : > { %1209 = vmatprep.subr.bf16.mxu0 %v1739_v3  ;;  %1250 = vmatprep.subr.bf16.mxu1 %v1742_v4  ;;  %v1832_v1 = vld [vmem:[%s2461_s3 + $0x1f4] ss:$8 sps:$4 sm:$0xff]   ;;  %v1830_v3 = vld [vmem:[%s2461_s3 + $0x1f0] ss:$8 sps:$4 sm:$0xff]   ;;  %v377_v4 = vlaneseq }
  0x4f   : > { %750 = vmatmul.mubr.bf16.vlgmr.msra.gmra.mrb[0].mxu0 %v309_v5  ;;  %791 = vmatmul.mubr.bf16.vlgmr.msra.gmra.mrb[0].mxu1 %v309_v5  ;;  %v378_v5 = vshrl.u32 %v377_v4, 7 }
  0x50   : > { %1210 = vmatpush1.bf16.msra.mxu0 %v1737_v6  ;;  %1251 = vmatpush1.bf16.msra.mxu1 %v1740_v7 }
  0x51   : > { %1211 = vmatprep.subr.bf16.mxu0 %v1745_v8  ;;  %1252 = vmatprep.subr.bf16.mxu1 %v1748_v9  ;;  %v379_v6 = vsub.s32 0, %v378_v5  ;;  %v387_v7 = vsub.s32 2, %v378_v5  ;;  %v375_v8 = vld [vmem:[%s2460_s2] sm:$0xf]  ;;  %v383_v9 = vsub.s32 1, %v378_v5 }
  0x54   : > { %1212 = vmatpush1.bf16.msra.mxu0 %v1743_v10  ;;  %1253 = vmatpush1.bf16.msra.mxu1 %v1746_v11  ;;  %v391_v10 = vsub.s32 3, %v378_v5  ;;  %v380_v11 = vrot.slane %v375_v8, %v379_v6 }
  0x55   : > { %1213 = vmatprep.subr.bf16.mxu0 %v1751_v12  ;;  %1254 = vmatprep.subr.bf16.mxu1 %v1754_v13  ;;  %v388_v12 = vrot.slane %v375_v8, %v387_v7  ;;  %v384_v13 = vrot.slane %v375_v8, %v383_v9 }
  0x58   : > { %1214 = vmatpush1.bf16.msra.mxu0 %v1749_v14  ;;  %1255 = vmatpush1.bf16.msra.mxu1 %v1752_v15  ;;  %v392_v14 = vrot.slane %v375_v8, %v391_v10 }
  0x59   : > { %1215 = vmatprep.subr.bf16.mxu0 %v1757_v16  ;;  %1256 = vmatprep.subr.bf16.mxu1 %v1760_v17 }
  0x5c   : > { %1216 = vmatpush1.bf16.msra.mxu0 %v1755_v18  ;;  %1257 = vmatpush1.bf16.msra.mxu1 %v1758_v19 }
  0x5d   : > { %1217 = vmatprep.subr.bf16.mxu0 %v1763_v20  ;;  %1258 = vmatprep.subr.bf16.mxu1 %v1766_v21 }
  0x60   : > { %1218 = vmatpush1.bf16.msra.mxu0 %v1761_v22  ;;  %1259 = vmatpush1.bf16.msra.mxu1 %v1764_v23 }
  0x61   : > { %1219 = vmatprep.subr.bf16.mxu0 %v1769_v24  ;;  %1260 = vmatprep.subr.bf16.mxu1 %v1772_v25 }
  0x64   : > { %1220 = vmatpush1.bf16.msra.mxu0 %v1767_v26  ;;  %1261 = vmatpush1.bf16.msra.mxu1 %v1770_v27 }
  0x65   : > { %1221 = vmatprep.subr.bf16.mxu0 %v1775_v28  ;;  %1262 = vmatprep.subr.bf16.mxu1 %v1778_v29 }
  0x68   : > { %1222 = vmatpush1.bf16.msra.mxu0 %v1773_v30  ;;  %1263 = vmatpush1.bf16.msra.mxu1 %v1776_v31 }
  0x69   : > { %1223 = vmatprep.subr.bf16.mxu0 %v1781_v32  ;;  %1264 = vmatprep.subr.bf16.mxu1 %v1784_v33 }
  0x6c   : > { %1224 = vmatpush1.bf16.msra.mxu0 %v1779_v34  ;;  %1265 = vmatpush1.bf16.msra.mxu1 %v1782_v35 }
  0x6d   : > { %1225 = vmatprep.subr.bf16.mxu0 %v1787_v36  ;;  %1266 = vmatprep.subr.bf16.mxu1 %v1790_v37 }
  0x70   : > { %1226 = vmatpush1.bf16.msra.mxu0 %v1785_v38  ;;  %1267 = vmatpush1.bf16.msra.mxu1 %v1788_v39 }
  0x71   : > { %1227 = vmatprep.subr.bf16.mxu0 %v1793_v40  ;;  %1268 = vmatprep.subr.bf16.mxu1 %v1796_v41 }
  0x74   : > { %1228 = vmatpush1.bf16.msra.mxu0 %v1791_v42  ;;  %1269 = vmatpush1.bf16.msra.mxu1 %v1794_v43 }
  0x75   : > { %1229 = vmatprep.subr.bf16.mxu0 %v1799_v44  ;;  %1270 = vmatprep.subr.bf16.mxu1 %v1802_v45 }
  0x78   : > { %1230 = vmatpush1.bf16.msra.mxu0 %v1797_v46  ;;  %1271 = vmatpush1.bf16.msra.mxu1 %v1800_v47 }
  0x79   : > { %1231 = vmatprep.subr.bf16.mxu0 %v1805_v48  ;;  %1272 = vmatprep.subr.bf16.mxu1 %v1808_v49 }
  0x7c   : > { %1232 = vmatpush1.bf16.msra.mxu0 %v1803_v50  ;;  %1273 = vmatpush1.bf16.msra.mxu1 %v1806_v51  ;;  %v1300_v51 = vld [vmem:[%s2462_s4] sm:$0x3] }
  0x7d   : > { %1233 = vmatprep.subr.bf16.mxu0 %v1811_v52  ;;  %1274 = vmatprep.subr.bf16.mxu1 %v1814_v53  ;;  %v1305_v53 = vrot.slane %v1300_v51, %v379_v6 }
  0x80   : > { %1234 = vmatpush1.bf16.msra.mxu0 %v1809_v54  ;;  %1275 = vmatpush1.bf16.msra.mxu1 %v1812_v55 }
  0x81   : > { %1235 = vmatprep.subr.bf16.mxu0 %v1817_v56  ;;  %1276 = vmatprep.subr.bf16.mxu1 %v1820_v57  ;;  %v1309_v56 = vrot.slane %v1300_v51, %v383_v9 }
  0x84   : > { %1236 = vmatpush1.bf16.msra.mxu0 %v1815_v58  ;;  %1277 = vmatpush1.bf16.msra.mxu1 %v1818_v59 }
  0x85   : > { %1237 = vmatprep.subr.bf16.mxu0 %v1823_v60  ;;  %1278 = vmatprep.subr.bf16.mxu1 %v1826_v61 }
  0x88   : > { %1238 = vmatpush1.bf16.msra.mxu0 %v1821_v62  ;;  %1279 = vmatpush1.bf16.msra.mxu1 %v1824_v63 }
  0x89   : > { %1239 = vmatprep.subr.bf16.mxu0 %v1829_v0  ;;  %1280 = vmatprep.subr.bf16.mxu1 %v1832_v1 }
  0x8c   : > { %1240 = vmatpush1.bf16.msra.mxu0 %v1827_v2  ;;  %1281 = vmatpush1.bf16.msra.mxu1 %v1830_v3 }
 0x122   : > { %v751_v15 = vpop.f32.mrb[0].mxu0  ;;  %v792_v16 = vpop.f32.mrb[0].mxu1 }
 0x123   : > { %v752_v17 = vadd.f32 %v751_v15, %v380_v11  ;;  %v793_v18 = vadd.f32 %v792_v16, %v388_v12  ;;  %v753_v19 = vpop.f32.mrb[1].mxu0  ;;  %v794_v20 = vpop.f32.mrb[1].mxu1 }
 0x124   : > { %v754_v21 = vadd.f32 %v753_v19, %v384_v13  ;;  %v795_v22 = vadd.f32 %v794_v20, %v392_v14  ;;  %v755_v23 = vpop.f32.mrb[2].mxu0  ;;  %v796_v24 = vpop.f32.mrb[2].mxu1 }
 0x125   : > { %v803_v25 = vmul.f32 0.70710677, %v752_v17  ;;  %v805_v26 = vmul.f32 0.70710677, %v793_v18  ;;  %v756_v29 = vpop.f32.mrb[3].mxu0  ;;  %v797_v30 = vpop.f32.mrb[3].mxu1 }
 0x126   : > { %v804_v27 = vmul.f32 0.70710677, %v754_v21  ;;  %v806_v28 = vmul.f32 0.70710677, %v795_v22  ;;  %v799_v35 = vmul.f32 0.5, %v752_v17  ;;  %v801_v38 = vmul.f32 0.5, %v793_v18 }
 0x127   : > { %1833 = verf.f32 %v803_v25  ;;  %v800_v39 = vmul.f32 0.5, %v754_v21  ;;  %v802_v42 = vmul.f32 0.5, %v795_v22 }
 0x128   : > { %1835 = verf.f32 %v805_v26 }
 0x129   : > { %1837 = verf.f32 %v804_v27 }
 0x12a   : > { %1839 = verf.f32 %v806_v28 }
 0x131   : > { %v1834_v31 = vpop.eup %1833 }
 0x132   : > { %v1836_v32 = vpop.eup %1835  ;;  %v811_v33 = vadd.f32 1.0, %v1834_v31 }
 0x133   : > { %v1838_v34 = vpop.eup %1837  ;;  %v813_v36 = vadd.f32 1.0, %v1836_v32 }
 0x134   : > { %v1840_v37 = vpop.eup %1839  ;;  %v812_v40 = vadd.f32 1.0, %v1838_v34  ;;  %v815_v41 = vmul.f32 %v811_v33, %v799_v35 }
 0x135   : > { %v814_v43 = vadd.f32 1.0, %v1840_v37  ;;  %v817_v44 = vmul.f32 %v813_v36, %v801_v38 }
 0x136   : > { %v816_v45 = vmul.f32 %v812_v40, %v800_v39  ;;  %v821_v48 = vpack.c.bf16 %v815_v41, %v815_v41 }
 0x137   : > { %v818_v46 = vmul.f32 %v814_v43, %v802_v42  ;;  %v823_v50 = vpack.c.bf16 %v817_v44, %v817_v44 }
 0x138   : > { %v822_v47 = vpack.c.bf16 %v816_v45, %v816_v45 }
 0x139   : > { %v824_v49 = vpack.c.bf16 %v818_v46, %v818_v46 }
 0x13a   : > { %1241 = vmatprep.mubr.bf16.mxu0 %v822_v47 }
 0x13b   : > { %1282 = vmatprep.mubr.bf16.mxu1 %v824_v49  ;;  %1242 = vmatmul.mubr.bf16.vlgmr.msra.gmra.mrb[4].mxu0 %v821_v48 }
 0x13c   : > { %1283 = vmatmul.mubr.bf16.vlgmr.msra.gmra.mrb[4].mxu1 %v823_v50 }
 0x20e   : > { %v1243_v52 = vpop.f32.mrb[4].mxu0 }
 0x20f   : > { %v1284_v54 = vpop.f32.mrb[4].mxu1  ;;  %v1245_v55 = vpop.f32.mrb[5].mxu0 }
 0x210   : > { %v1285_v57 = vadd.f32 %v1284_v54, %v1243_v52  ;;  %v1286_v58 = vpop.f32.mrb[5].mxu1  ;;  %v1247_v59 = vpop.f32.mrb[6].mxu0 }
 0x211   : > { %v1287_v60 = vadd.f32 %v1286_v58, %v1245_v55  ;;  %v1288_v61 = vpop.f32.mrb[6].mxu1  ;;  %v1248_v62 = vpop.f32.mrb[7].mxu0 }
 0x212   : > { %v1312_v63 = vadd.f32 %v1305_v53, %v1285_v57  ;;  %v1289_v0 = vpop.f32.mrb[7].mxu1 }
 0x213   : > { %v1313_v1 = vadd.f32 %v1309_v56, %v1287_v60 }
 0x214   : > { %1314 = vst [vmem:[%s277_s7] sm:$0xff] %v1312_v63 }
 0x215   : > { %1315 = vst [vmem:[%s277_s7 + $0x8] sm:$0xff] %v1313_v1 }
 0x216   : > { %1854 = shalt.err (!%p1851_p5)
}
 0x217   : > { %s1855_s16 = scalar_lea.hbm %s2411_s8, 256  ;;  %s1859_s25 = scalar_lea.hbm %s2463_s5, 512 }
 0x218   : > { %p1856_p6 = scmp.ne.s32.totalorder %s2411_s8, %s1855_s16  ;;  %p1860_p10 = scmp.lt.u32.totalorder %s2411_s8, %s2463_s5 }
 0x219   : > { %p1861_p11 = scmp.lt.u32.totalorder %s1859_s25, %s1855_s16  ;;  %p1863_p13 = scmp.lt.u32.totalorder %s1855_s16, %s2411_s8 }
 0x21a   : > { %p1857_p7 = pnand %p1856_p6, %p1992_p4 }
 0x21b   : > { %p1862_p12 = por %p1861_p11, %p1860_p10 }
 0x21c   : > { %p1858_p9 = pneg %p1857_p7 }
 0x21d   : > { %p1864_p0 = por %p1863_p13, %p1862_p12 }
 0x21f   : > { %p1865_p1 = pnand %p1864_p0, %p1858_p9 }
 0x221   : > { %1868 = shalt.err (!%p1865_p1)
}
 0x222   : > { %1586 = dma.vmem_to_hbm [thread:$0]  (%p1992_p4), %s2413_s9, 256, %s2411_s8, %s1317_s21  }
 0x223 PF: > { %p1592_p2 = scmp.ge.s32.totalorder %s1919_s23, 2  ;;  %s1343_s7 = sand.u32 1, %s1899_s18  }
 0x224   : > { %s1344_s10 = scalar_lea.sflag [#allocation4], %s1343_s7 }
 0x225   : > { %p1589_p3 = pnand %p1592_p2, %p1999_p8 }
 0x227   : > { %1894 = dma.done.wait (!%p1589_p3), %s1344_s10, 256  }
 0x228   : > { %1896 = vsyncadd (!%p1589_p3), %s1344_s10, 4294967040  ;;  %s18_s23 = sadd.s32 1, %s1919_s23   ;;  %s2466_s18 = smov %s1903_s19 }
 0x229   : > { %p15_p5 = scmp.ge.s32.totalorder %s18_s23, 4   ;;  %s2467_s19 = smov %s1907_s20 }
 0x22a   : > { %s2468_s20 = smov %s2005_s6  ;;  %s2469_s21 = smov %s1915_s22 }
 0x22b   : > { %s2470_s22 = smov %s2472_s26  ;;  %17 = sbr.rel (!%p15_p5) target bundleno = 4 (0x4), region = 92 }
 0x232   :  { %1349 = vsyncpa [#allocation4], 1 }
 0x233   :  { %1351 = vsyncpa [#allocation4 + $0x1], 1 }

</bundles_post_ra>
